<compile_context>
chip_gen: v7x
topology: tpu7x:2x2x1
jax: 0.10.0
libtpu: 0.0.40
codegen_flags: <defaults>
</compile_context>

<pallas_src>
import math
from functools import partial

import jax
import jax.numpy as jnp
from jax import lax
from jax.experimental import pallas as pl
from jax.experimental.pallas import tpu as pltpu


def _round_up(x, m):
    return (x + m - 1) // m * m


def _vmem_budget_bytes():
    """Per-core VMEM budget with ~25% headroom for compiler scratch."""
    cap = 64 * 1024 * 1024
    try:
        info = pltpu.get_tpu_info()
        cap = int(getattr(info, "vmem_capacity_bytes", cap) or cap)
    except Exception:
        pass
    return (cap * 3) // 4


_SQRT_2_OVER_PI = math.sqrt(2.0 / math.pi)
_INV_SQRT_2 = 1.0 / math.sqrt(2.0)


def _gelu_f32(h, approximate):
    if approximate:
        # tanh formulation -> EUP slot (otherwise idle; co-issues with MXU/VALU).
        inner = jnp.float32(_SQRT_2_OVER_PI) * (h + jnp.float32(0.044715) * h * h * h)
        return 0.5 * h * (1.0 + jnp.tanh(inner))
    # Exact GELU (PyTorch nn.GELU default).
    return 0.5 * h * (1.0 + lax.erf(h * jnp.float32(_INV_SQRT_2)))


def _make_ffn_kernel(approx_gelu, use_acc, cast_x):
    """Kernel factory.  Scratch order: [x_cast (if cast_x)], [acc (if use_acc)]."""

    def kernel(x_ref, w1_ref, b1_ref, w2_ref, b2_ref, o_ref, *scratch):
        si = 0
        if cast_x:
            xc_ref = scratch[si]
            si += 1
        if use_acc:
            acc_ref = scratch[si]
            si += 1

        k = pl.program_id(1)
        nk = pl.num_programs(1)

        if cast_x:
            # Cast the (hidden-axis-invariant) x tile once per token tile.
            @pl.when(k == 0)
            def _cast():
                xc_ref[...] = x_ref[...].astype(xc_ref.dtype)

            x = xc_ref[...]
        else:
            x = x_ref[...]

        # fc1 chunk on the MXU -> f32.
        h = jnp.dot(x, w1_ref[...], preferred_element_type=jnp.float32)
        h = h + b1_ref[...].astype(jnp.float32)
        h = _gelu_f32(h, approx_gelu)
        # Dropout -> identity at inference.

        # Partial fc2 for this hidden chunk.
        part = jnp.dot(h.astype(w2_ref.dtype), w2_ref[...],
                       preferred_element_type=jnp.float32)

        if use_acc:
            @pl.when(k == 0)
            def _init():
                acc_ref[...] = jnp.zeros_like(acc_ref)

            acc_ref[...] += part

            @pl.when(k == nk - 1)
            def _fin():
                y = acc_ref[...] + b2_ref[...].astype(jnp.float32)
                # Dropout -> identity at inference.
                o_ref[...] = y.astype(o_ref.dtype)
        else:
            # f32 output: accumulate directly into the resident output tile.
            @pl.when(k == 0)
            def _first():
                o_ref[...] = part + b2_ref[...].astype(jnp.float32)

            @pl.when(k != 0)
            def _rest():
                o_ref[...] += part

    return kernel


@partial(jax.jit, static_argnames=("dim", "out_dim", "tm", "tn_h", "approx_gelu"))
def _ffn_forward(x, w1_p, b1_p, w2_p, b2_p, *, dim, out_dim, tm, tn_h, approx_gelu):
    dim_p, hid_p = w1_p.shape
    out_p = w2_p.shape[1]
    cdt = w1_p.dtype
    out_dtype = x.dtype

    lead_shape = x.shape[:-1]
    m = 1
    for s in lead_shape:
        m *= s
    x2d = x.reshape(m, dim)

    # Token tile: multiple of 8, capped at the padded token count.
    tm_eff = _round_up(min(tm, _round_up(m, 8)), 8)
    # Guarantee >=2 token tiles on the parallel axis (keeps both v7x TCs busy).
    if -(-m // tm_eff) < 2 and tm_eff >= 16:
        tm_eff = _round_up(tm_eff // 2, 8)
    m_p = _round_up(m, tm_eff)

    # Pad x only (no cast / no weight copies here); cast happens in-kernel.
    x_p = jnp.pad(x2d, ((0, m_p - m), (0, dim_p - dim)))

    cast_x = jnp.dtype(x.dtype) != jnp.dtype(cdt)
    use_acc = jnp.dtype(out_dtype) != jnp.dtype(jnp.float32)

    scratch_shapes = []
    if cast_x:
        scratch_shapes.append(pltpu.VMEM((tm_eff, dim_p), cdt))
    if use_acc:
        scratch_shapes.append(pltpu.VMEM((tm_eff, out_p), jnp.float32))

    x_isz = jnp.dtype(x.dtype).itemsize
    c_isz = jnp.dtype(cdt).itemsize
    o_isz = jnp.dtype(out_dtype).itemsize

    vmem_needed = (
        2 * tm_eff * dim_p * x_isz
        + (tm_eff * dim_p * c_isz if cast_x else 0)
        + 2 * dim_p * tn_h * c_isz
        + 2 * tn_h * 4
        + 2 * tn_h * out_p * c_isz
        + 2 * out_p * 4
        + 2 * tm_eff * out_p * o_isz
        + (tm_eff * out_p * 4 if use_acc else 0)
    )
    budget = _vmem_budget_bytes()
    vmem_limit = int(max(min(budget, max(vmem_needed + (8 << 20), 32 << 20)),
                         vmem_needed + (1 << 20)))

    n_i = m_p // tm_eff
    n_k = hid_p // tn_h
    grid = (n_i, n_k)

    cost = pl.CostEstimate(
        flops=2 * m_p * (dim_p * hid_p + hid_p * out_p),
        transcendentals=m_p * hid_p,
        bytes_accessed=int(
            m_p * dim_p * x_isz
            + n_i * (w1_p.size * c_isz + w2_p.size * c_isz
                     + b1_p.size * 4 + b2_p.size * 4)
            + m_p * out_p * o_isz
        ),
    )

    kernel = _make_ffn_kernel(approx_gelu, use_acc, cast_x)

    out2d = pl.pallas_call(
        kernel,
        out_shape=jax.ShapeDtypeStruct((m_p, out_p), out_dtype),
        grid_spec=pltpu.PrefetchScalarGridSpec(
            num_scalar_prefetch=0,
            grid=grid,
            in_specs=[
                pl.BlockSpec((tm_eff, dim_p), lambda i, k: (i, 0)),   # x tile (k-invariant)
                pl.BlockSpec((dim_p, tn_h), lambda i, k: (0, k)),     # W1 chunk
                pl.BlockSpec((1, tn_h), lambda i, k: (0, k)),         # b1 chunk
                pl.BlockSpec((tn_h, out_p), lambda i, k: (k, 0)),     # W2 chunk
                pl.BlockSpec((1, out_p), lambda i, k: (0, 0)),        # b2 (invariant)
            ],
            out_specs=pl.BlockSpec((tm_eff, out_p), lambda i, k: (i, 0)),
            scratch_shapes=scratch_shapes,
        ),
        compiler_params=pltpu.CompilerParams(
            dimension_semantics=("parallel", "arbitrary"),
            vmem_limit_bytes=vmem_limit,
        ),
        cost_estimate=cost,
    )(x_p, w1_p, b1_p, w2_p, b2_p)

    return out2d[:m, :out_dim].reshape(*lead_shape, out_dim)


class FeedForwardPallas:
    """Inference-mode FeedForward: fc1 -> GELU -> (drop=id) -> fc2 -> (drop=id).

    Weights are padded to lane-dense (multiple-of-128) shapes and cast to the
    MXU compute dtype ONCE at construction; per call, only x is padded.
    """

    def __init__(self, w1, b1, w2, b2, *, tm=512, tn_h=512,
                 compute_dtype=jnp.bfloat16, approx_gelu=True):
        dim, hidden = w1.shape
        hidden2, out_dim = w2.shape
        assert hidden2 == hidden and b1.shape == (hidden,) and b2.shape == (out_dim,)
        self.dim, self.hidden, self.out_dim = dim, hidden, out_dim
        self.approx_gelu = bool(approx_gelu)

        cdt = jnp.dtype(compute_dtype)
        isz = cdt.itemsize

        dim_p = _round_up(dim, 128)
        out_p = _round_up(out_dim, 128)
        hid_full_p = _round_up(hidden, 128)

        budget = _vmem_budget_bytes()
        tm_req = _round_up(max(tm, 8), 8)

        def needed(tm_, tnh_):
            # Conservative (worst-case) working set: f32 x/out tiles, both scratches.
            return (2 * tm_ * dim_p * 4          # x tile (double-buffered)
                    + tm_ * dim_p * isz          # x cast scratch
                    + 2 * dim_p * tnh_ * isz     # W1 chunk
                    + 2 * tnh_ * 4               # b1 chunk
                    + 2 * tnh_ * out_p * isz     # W2 chunk
                    + 2 * out_p * 4              # b2
                    + 2 * tm_ * out_p * 4        # out tile
                    + tm_ * out_p * 4)           # f32 accumulator

        # --- hidden-chunk selection: prefer a single k step; else grow/shrink. ---
        tn_h_eff = min(_round_up(max(tn_h, 128), 128), hid_full_p)
        if needed(tm_req, hid_full_p) <= budget:
            tn_h_eff = hid_full_p
        else:
            while (tn_h_eff * 2 <= hid_full_p
                   and _round_up(hidden, tn_h_eff * 2) == hid_full_p
                   and needed(tm_req, tn_h_eff * 2) <= budget):
                tn_h_eff *= 2
            while tn_h_eff > 128 and needed(tm_req, tn_h_eff) > budget:
                tn_h_eff = max(128, _round_up(tn_h_eff // 2, 128))

        # --- token-tile shrink if still over budget. ---
        tm_eff = tm_req
        while tm_eff > 8 and needed(tm_eff, tn_h_eff) > budget:
            tm_eff = max(8, _round_up(tm_eff // 2, 8))

        self.tm = tm_eff
        self.tn_h = tn_h_eff

        hid_p = _round_up(hidden, tn_h_eff)

        # Pad & cast weights once (static across calls); biases stay f32.
        self.w1_p = jnp.pad(w1, ((0, dim_p - dim), (0, hid_p - hidden))).astype(cdt)
        self.b1_p = jnp.pad(b1.astype(jnp.float32), (0, hid_p - hidden)).reshape(1, hid_p)
        self.w2_p = jnp.pad(w2, ((0, hid_p - hidden), (0, out_p - out_dim))).astype(cdt)
        self.b2_p = jnp.pad(b2.astype(jnp.float32), (0, out_p - out_dim)).reshape(1, out_p)

    def __call__(self, x):
        return _ffn_forward(x, self.w1_p, self.b1_p, self.w2_p, self.b2_p,
                            dim=self.dim, out_dim=self.out_dim,
                            tm=self.tm, tn_h=self.tn_h,
                            approx_gelu=self.approx_gelu)


def init_feed_forward_params(key, dim, hidden_dim, out_dim=None, dtype=jnp.float32):
    """Synthetic init mimicking nn.Linear's uniform(-1/sqrt(fan_in), 1/sqrt(fan_in))."""
    if out_dim is None:
        out_dim = dim
    k1, k2, k3, k4 = jax.random.split(key, 4)
    bound1 = 1.0 / math.sqrt(dim)
    bound2 = 1.0 / math.sqrt(hidden_dim)
    # Stored transposed relative to PyTorch: (in_features, out_features).
    w1 = jax.random.uniform(k1, (dim, hidden_dim), dtype, -bound1, bound1)
    b1 = jax.random.uniform(k2, (hidden_dim,), dtype, -bound1, bound1)
    w2 = jax.random.uniform(k3, (hidden_dim, out_dim), dtype, -bound2, bound2)
    b2 = jax.random.uniform(k4, (out_dim,), dtype, -bound2, bound2)
    return w1, b1, w2, b2


def _reference(x, w1, b1, w2, b2):
    # Exact-erf GELU (PyTorch nn.GELU default), f32, dropout=identity (eval).
    h = x @ w1 + b1
    h = 0.5 * h * (1.0 + lax.erf(h / jnp.sqrt(2.0)))
    return h @ w2 + b2


if __name__ == "__main__":
    key = jax.random.PRNGKey(0)
    kx, kp = jax.random.split(key)

    batch, seq, dim, hidden_dim = 2, 8, 32, 64
    dropout = 0.1  # identity at inference

    x = jax.random.normal(kx, (batch, seq, dim), jnp.float32)
    w1, b1, w2, b2 = init_feed_forward_params(kp, dim, hidden_dim)
    ref = _reference(x, w1, b1, w2, b2)

    # Default fast path: bf16 MXU operands + tanh GELU, f32 accumulation,
    # f32 output accumulated directly into o_ref.
    ffn_fast = FeedForwardPallas(w1, b1, w2, b2)
    out_fast = jax.block_until_ready(ffn_fast(x))
    assert out_fast.shape == (batch, seq, dim), out_fast.shape
    assert jnp.allclose(out_fast, ref, atol=5e-2, rtol=5e-2), \
        float(jnp.max(jnp.abs(out_fast - ref)))

    # bf16 activations / bf16 output -> exercises the scratch-accumulator path.
    out_bf16 = jax.block_until_ready(ffn_fast(x.astype(jnp.bfloat16)))
    assert out_bf16.shape == (batch, seq, dim), out_bf16.shape
    assert jnp.allclose(out_bf16.astype(jnp.float32), ref, atol=7e-2, rtol=7e-2), \
        float(jnp.max(jnp.abs(out_bf16.astype(jnp.float32) - ref)))

    # Exact path: f32 MXU operands + exact erf GELU (matches nn.GELU default).
    ffn_exact = FeedForwardPallas(w1, b1, w2, b2,
                                  compute_dtype=jnp.float32, approx_gelu=False)
    out_exact = jax.block_until_ready(ffn_exact(x))
    assert out_exact.shape == (batch, seq, dim), out_exact.shape
    assert jnp.allclose(out_exact, ref, atol=1e-4, rtol=1e-4), \
        float(jnp.max(jnp.abs(out_exact - ref)))

    print("KERNEL_OK")
</pallas_src>

<mosaic_0001>
module attributes {stable_mosaic.version = 11 : i64} {
  func.func @kernel(%arg0: i32, %arg1: i32, %arg2: memref<8x128xf32, #tpu.memory_space<vmem>>, %arg3: memref<128x128xbf16, #tpu.memory_space<vmem>>, %arg4: memref<1x128xf32, #tpu.memory_space<vmem>>, %arg5: memref<128x128xbf16, #tpu.memory_space<vmem>>, %arg6: memref<1x128xf32, #tpu.memory_space<vmem>>, %arg7: memref<8x128xf32, #tpu.memory_space<vmem>>, %arg8: memref<8x128xbf16, #tpu.memory_space<vmem>>) attributes {dimension_semantics = [#tpu.dimension_semantics<parallel>, #tpu.dimension_semantics<arbitrary>], iteration_bounds = array<i64: 2, 1>, scalar_prefetch = 0 : i64, scratch_operands = 1 : i64, tpu.core_type = #tpu.core_type<tc>, window_params = [{transform_indices = @transform_0, window_bounds = array<i64: 8, 128>}, {transform_indices = @transform_1, window_bounds = array<i64: 128, 128>}, {transform_indices = @transform_2, window_bounds = array<i64: 1, 128>}, {transform_indices = @transform_3, window_bounds = array<i64: 128, 128>}, {pipeline_mode = #tpu.pipeline_mode<synchronous>, transform_indices = @transform_4, window_bounds = array<i64: 1, 128>}, {transform_indices = @transform_5, window_bounds = array<i64: 8, 128>}]} {
    %c0_i32 = arith.constant 0 : i32
    %0 = arith.cmpi eq, %arg1, %c0_i32 : i32
    %1 = arith.extui %0 : i1 to i32
    %c0_i32_0 = arith.constant 0 : i32
    %2 = arith.cmpi ne, %1, %c0_i32_0 : i32
    scf.if %2 {
      %c0_17 = arith.constant 0 : index
      %c0_18 = arith.constant 0 : index
      %31 = vector.load %arg2[%c0_17, %c0_18] : memref<8x128xf32, #tpu.memory_space<vmem>>, vector<8x128xf32>
      %32 = arith.truncf %31 : vector<8x128xf32> to vector<8x128xbf16>
      %c0_19 = arith.constant 0 : index
      %c0_20 = arith.constant 0 : index
      %33 = vector.load %arg8[%c0_19, %c0_20] : memref<8x128xbf16, #tpu.memory_space<vmem>>, vector<8x128xbf16>
      tpu.vector_store %arg8[%c0_19, %c0_20], %32 {strides = array<i32>} : memref<8x128xbf16, #tpu.memory_space<vmem>>, vector<8x128xbf16>,
    } else {
    }
    %c0 = arith.constant 0 : index
    %c0_1 = arith.constant 0 : index
    %3 = vector.load %arg8[%c0, %c0_1] : memref<8x128xbf16, #tpu.memory_space<vmem>>, vector<8x128xbf16>
    %c0_2 = arith.constant 0 : index
    %c0_3 = arith.constant 0 : index
    %4 = vector.load %arg3[%c0_2, %c0_3] : memref<128x128xbf16, #tpu.memory_space<vmem>>, vector<128x128xbf16>
    %cst = arith.constant dense<0.000000e+00> : vector<8x128xf32>
    %5 = tpu.matmul %3, %4, %cst {dimension_numbers = #tpu.dot_dimension_numbers<[1], [0], [0], [1], [0, 0, 1, 1], [], []>} : vector<8x128xbf16>, vector<128x128xbf16>, vector<8x128xf32> -> vector<8x128xf32>
    %c0_4 = arith.constant 0 : index
    %c0_5 = arith.constant 0 : index
    %6 = vector.load %arg4[%c0_4, %c0_5] : memref<1x128xf32, #tpu.memory_space<vmem>>, vector<1x128xf32>
    %7 = vector.broadcast %6 : vector<1x128xf32> to vector<8x128xf32>
    %8 = arith.addf %5, %7 : vector<8x128xf32>
    %cst_6 = arith.constant 4.471500e-02 : f32
    %9 = vector.broadcast %cst_6 : f32 to vector<8x128xf32>
    %10 = arith.mulf %9, %8 : vector<8x128xf32>
    %11 = arith.mulf %10, %8 : vector<8x128xf32>
    %12 = arith.mulf %11, %8 : vector<8x128xf32>
    %13 = arith.addf %8, %12 : vector<8x128xf32>
    %cst_7 = arith.constant 0.797884583 : f32
    %14 = vector.broadcast %cst_7 : f32 to vector<8x128xf32>
    %15 = arith.mulf %14, %13 : vector<8x128xf32>
    %cst_8 = arith.constant 5.000000e-01 : f32
    %16 = vector.broadcast %cst_8 : f32 to vector<8x128xf32>
    %17 = arith.mulf %16, %8 : vector<8x128xf32>
    %18 = math.tanh %15 : vector<8x128xf32>
    %cst_9 = arith.constant 1.000000e+00 : f32
    %19 = vector.broadcast %cst_9 : f32 to vector<8x128xf32>
    %20 = arith.addf %19, %18 : vector<8x128xf32>
    %21 = arith.mulf %17, %20 : vector<8x128xf32>
    %22 = arith.truncf %21 : vector<8x128xf32> to vector<8x128xbf16>
    %c0_10 = arith.constant 0 : index
    %c0_11 = arith.constant 0 : index
    %23 = vector.load %arg5[%c0_10, %c0_11] : memref<128x128xbf16, #tpu.memory_space<vmem>>, vector<128x128xbf16>
    %cst_12 = arith.constant dense<0.000000e+00> : vector<8x128xf32>
    %24 = tpu.matmul %22, %23, %cst_12 {dimension_numbers = #tpu.dot_dimension_numbers<[1], [0], [0], [1], [0, 0, 1, 1], [], []>} : vector<8x128xbf16>, vector<128x128xbf16>, vector<8x128xf32> -> vector<8x128xf32>
    %c0_i32_13 = arith.constant 0 : i32
    %25 = arith.cmpi eq, %arg1, %c0_i32_13 : i32
    %26 = arith.extui %25 : i1 to i32
    %c0_i32_14 = arith.constant 0 : i32
    %27 = arith.cmpi ne, %26, %c0_i32_14 : i32
    scf.if %27 {
      %c0_17 = arith.constant 0 : index
      %c0_18 = arith.constant 0 : index
      %31 = vector.load %arg6[%c0_17, %c0_18] : memref<1x128xf32, #tpu.memory_space<vmem>>, vector<1x128xf32>
      %32 = vector.broadcast %31 : vector<1x128xf32> to vector<8x128xf32>
      %33 = arith.addf %24, %32 : vector<8x128xf32>
      %c0_19 = arith.constant 0 : index
      %c0_20 = arith.constant 0 : index
      %34 = vector.load %arg7[%c0_19, %c0_20] : memref<8x128xf32, #tpu.memory_space<vmem>>, vector<8x128xf32>
      tpu.vector_store %arg7[%c0_19, %c0_20], %33 {strides = array<i32>} : memref<8x128xf32, #tpu.memory_space<vmem>>, vector<8x128xf32>,
    } else {
    }
    %c0_i32_15 = arith.constant 0 : i32
    %28 = arith.cmpi ne, %arg1, %c0_i32_15 : i32
    %29 = arith.extui %28 : i1 to i32
    %c0_i32_16 = arith.constant 0 : i32
    %30 = arith.cmpi ne, %29, %c0_i32_16 : i32
    scf.if %30 {
      %c0_17 = arith.constant 0 : index
      %c0_18 = arith.constant 0 : index
      %31 = vector.load %arg7[%c0_17, %c0_18] : memref<8x128xf32, #tpu.memory_space<vmem>>, vector<8x128xf32>
      %32 = arith.addf %31, %24 : vector<8x128xf32>
      %c0_19 = arith.constant 0 : index
      %c0_20 = arith.constant 0 : index
      %33 = vector.load %arg7[%c0_19, %c0_20] : memref<8x128xf32, #tpu.memory_space<vmem>>, vector<8x128xf32>
      tpu.vector_store %arg7[%c0_19, %c0_20], %32 {strides = array<i32>} : memref<8x128xf32, #tpu.memory_space<vmem>>, vector<8x128xf32>,
    } else {
    }
    return
  }
  func.func @transform_0(%arg0: i32, %arg1: i32) -> (i32, i32) {
    %c0_i32 = arith.constant 0 : i32
    %c0_i32_0 = arith.constant 0 : i32
    return %arg0, %c0_i32 : i32, i32
  }
  func.func @transform_1(%arg0: i32, %arg1: i32) -> (i32, i32) {
    %c0_i32 = arith.constant 0 : i32
    %c0_i32_0 = arith.constant 0 : i32
    return %c0_i32, %arg1 : i32, i32
  }
  func.func @transform_2(%arg0: i32, %arg1: i32) -> (i32, i32) {
    %c0_i32 = arith.constant 0 : i32
    %c0_i32_0 = arith.constant 0 : i32
    return %c0_i32, %arg1 : i32, i32
  }
  func.func @transform_3(%arg0: i32, %arg1: i32) -> (i32, i32) {
    %c0_i32 = arith.constant 0 : i32
    %c0_i32_0 = arith.constant 0 : i32
    return %arg1, %c0_i32 : i32, i32
  }
  func.func @transform_4(%arg0: i32, %arg1: i32) -> (i32, i32) {
    %c0_i32 = arith.constant 0 : i32
    %c0_i32_0 = arith.constant 0 : i32
    %c0_i32_1 = arith.constant 0 : i32
    return %c0_i32, %c0_i32_0 : i32, i32
  }
  func.func @transform_5(%arg0: i32, %arg1: i32) -> (i32, i32) {
    %c0_i32 = arith.constant 0 : i32
    %c0_i32_0 = arith.constant 0 : i32
    return %arg0, %c0_i32 : i32, i32
  }
}

</mosaic_0001>

<bundles_post_ra>
// kernel: _ffn_forward.1
= control target key start
LH: loop header
LB: loop body
LE: loop exit
PB: predicated region body
PF: predicated region fallthrough
CT: control target
= control target key end

     0   :  { %10 = vsyncpa [#allocation4], 0  ;;  %s1052_s0 = inlined_call_operand.vmem [shape: f32[16,128], index: 0, kind: input, shape index: {}]   ;;  %s1053_s1 = inlined_call_operand.hbm [shape: bf16[128,128], index: 1, kind: input, shape index: {}]   ;;  %s1054_s2 = inlined_call_operand.vmem [shape: f32[1,128], index: 2, kind: input, shape index: {}]   ;;  %s1055_s3 = inlined_call_operand.hbm [shape: bf16[128,128], index: 3, kind: input, shape index: {}]   ;;  %s1056_s4 = inlined_call_operand.vmem [shape: f32[1,128], index: 4, kind: input, shape index: {}]   ;;  %s1057_s5 = inlined_call_operand.vmem [shape: f32[16,128], index: 5, kind: output, shape index: {}]  }
   0x1   :  { %11 = vsyncpa [#allocation6], 0  ;;  %s926_s18 = smov 0   ;;  %s928_s19 = smov 0  }
   0x2   :  { %s930_s20 = smov 0  }
   0x3 LB: > { %s645_s21 = sadd.s32 4294967295, %s888_s20   ;;  %s29_s22 = sadd.s32 1, %s884_s19  ;;  %s888_s20 = sphi %s930_s20, %s17_s20   ;;  %s884_s19 = sphi %s928_s19, %s1067_s19   ;;  %s880_s18 = sphi %s926_s18, %s1066_s18  }
   0x4   : > { %p31_p0 = scmp.ge.s32.totalorder %s29_s22, 2  ;;  %p647_p1 = scmp.ge.s32.totalorder %s888_s20, 1 }
   0x5   : > { %p185_p2 = scmp.lt.s32.totalorder %s888_s20, 3  ;;  %p951_p4 = scmp.eq.s32.totalorder %s645_s21, 0 }
   0x6   : > { %s1069_s22 = smov (%p31_p0, %s29_s22), 0  ;;  %s890_s25 = smov [#allocation3]  }
   0x7   : > { %p947_p3 = pnand %p647_p1, %p185_p2  ;;  %s199_s26 = sshll.u32 %s890_s25, 4  ;;  %s200_s26 = int_to_ptr.vmem [resolvable:$true] %s199_s26 }
   0x8   : > { %s1062_s24 = scalar_select %p951_p4, 1, 0 }
   0x9   : > { %s1061_s23 = scalar_select %p947_p3, 1, 0 }
   0xa   : > { %p743_p5 = pneg %p947_p3  ;;  %s891_s28 = smov [#allocation5]  }
   0xb   : > { %s221_s29 = sshll.u32 %s891_s28, 4  ;;  %s802_s7 = scalar_lea.hbm %s1053_s1, 1024  ;;  %s963_s29 = int_to_ptr.vmem [resolvable:$true] %s221_s29 }
   0xc   : > { %p959_p6 = pnand %p951_p4, %p743_p5  ;;  %p803_p7 = scmp.ne.s32.totalorder %s1053_s1, %s802_s7 }
   0xd   : > { %p809_p11 = scmp.lt.u32.totalorder %s802_s7, %s1053_s1 }
   0xe   : > { %p804_p8 = pneg %p959_p6 }
  0x10   : > { %p805_p9 = pnand %p804_p8, %p803_p7 }
  0x12   : > { %p806_p10 = pneg %p805_p9 }
  0x14   : > { %p811_p12 = pnand %p809_p11, %p806_p10 }
  0x16   : > { %814 = shalt.err (!%p811_p12)
}
  0x17   : > { %s815_s12 = scalar_lea.vmem %s200_s26, 1024  ;;  %p823_p2 = scmp.lt.s32.totalorder %s200_s26, %s200_s26 }
  0x18   : > { %p816_p13 = scmp.ne.s32.totalorder %s200_s26, %s815_s12  ;;  %p824_p5 = scmp.lt.s32.totalorder %s815_s12, %s815_s12 }
  0x1a   : > { %p818_p0 = pnand %p816_p13, %p804_p8  ;;  %p825_p4 = por %p824_p5, %p823_p2 }
  0x1c   : > { %p819_p1 = pneg %p818_p0 }
  0x1e   : > { %p826_p3 = pnand %p825_p4, %p819_p1 }
  0x20   : > { %829 = shalt.err (!%p826_p3)
}
  0x21   : > { %s892_s13 = smov 64   ;;  %s893_s14 = smov 4  }
  0x22   : > { %746 = dma.hbm_to_vmem [thread:$0]  (!%p959_p6), %s1053_s1, 1024, %s200_s26, [#allocation4], %s892_s13, %s892_s13, %s893_s14  }
  0x23   : > { %s830_s25 = scalar_lea.hbm %s1055_s3, 1024 }
  0x24   : > { %p831_p7 = scmp.ne.s32.totalorder %s1055_s3, %s830_s25  ;;  %p837_p9 = scmp.lt.u32.totalorder %s830_s25, %s1055_s3 }
  0x26   : > { %p833_p3 = pnand %p831_p7, %p804_p8 }
  0x28   : > { %p834_p4 = pneg %p833_p3 }
  0x2a   : > { %p839_p10 = pnand %p837_p9, %p834_p4 }
  0x2c   : > { %842 = shalt.err (!%p839_p10)
}
  0x2d   : > { %s843_s26 = scalar_lea.vmem %s963_s29, 1024  ;;  %p851_p0 = scmp.lt.s32.totalorder %s963_s29, %s963_s29 }
  0x2e   : > { %p844_p11 = scmp.ne.s32.totalorder %s963_s29, %s843_s26  ;;  %p852_p1 = scmp.lt.s32.totalorder %s843_s26, %s843_s26 }
  0x30   : > { %p846_p12 = pnand %p844_p11, %p804_p8  ;;  %p853_p2 = por %p852_p1, %p851_p0 }
  0x32   : > { %p847_p13 = pneg %p846_p12 }
  0x34   : > { %p854_p5 = pnand %p853_p2, %p847_p13 }
  0x36   : > { %857 = shalt.err (!%p854_p5)
}
  0x37   : > { %749 = dma.hbm_to_vmem [thread:$0]  (!%p959_p6), %s1055_s3, 1024, %s963_s29, [#allocation6], %s892_s13, %s892_s13, %s893_s14  }
  0x38   : > { %p1064_p7 = scmp.ne.s32.totalorder %s1061_s23, 0 }
  0x39   : > { %p1065_p3 = scmp.ne.s32.totalorder (!%p1064_p7), %s1062_s24, 0 }
  0x3a   : > { %247 = sbr.rel (%p1064_p7) target bundleno = 558 (0x22e), region = 40 }
  0x41   : > { %871 = dma.done.wait (%p1065_p3), [#allocation4], 1024  }
  0x42   : > { %873 = vsyncadd (%p1065_p3), [#allocation4], 4294966272 }
  0x43   : > { %875 = dma.done.wait (%p1065_p3), [#allocation6], 1024  }
  0x44   : > { %877 = vsyncadd (%p1065_p3), [#allocation6], 4294966272  ;;  %v894_v0 = vmov 0.0   ;;  %vm895_vm0 = vmmov 0   ;;  %p280_p6 = scmp.lt.s32.totalorder %s880_s18, 1  ;;  %v784_v1 = vld [vmem:[#allocation3] sm:$0xff]  }
  0x45   : > { %695 = vmatprep.subr.bf16.mxu0 %v894_v0  ;;  %711 = vmatprep.mubr.msk.bf16.mxu0 %vm895_vm0, %v894_v0  ;;  %v785_v2 = vld [vmem:[#allocation3 + $0x8] sm:$0xff]   ;;  %v786_v3 = vld [vmem:[#allocation3 + $0x10] sm:$0xff]   ;;  %v787_v5 = vld [vmem:[#allocation3 + $0x18] sm:$0xff]  }
  0x46   : > { %715 = vmatprep.subr.bf16.mxu1 %v894_v0  ;;  %731 = vmatprep.mubr.msk.bf16.mxu1 %vm895_vm0, %v894_v0  ;;  %s1071_s18 = smov (!%p280_p6, %s880_s18), 1  ;;  %v792_v7 = vld [vmem:[#allocation5] sm:$0xff]   ;;  %v789_v9 = vld [vmem:[#allocation3 + $0x28] sm:$0xff]   ;;  %v790_v10 = vld [vmem:[#allocation3 + $0x30] sm:$0xff]  }
  0x47   : > { %696 = vmatpush3.bf16.msra.mxu0 %v784_v1  ;;  %s655_s23 = sshll.u32 %s1071_s18, 3  ;;  %716 = vmatpush3.bf16.msra.mxu1 %v792_v7  ;;  %v788_v8 = vld [vmem:[#allocation3 + $0x20] sm:$0xff]   ;;  %v791_v11 = vld [vmem:[#allocation3 + $0x38] sm:$0xff]   ;;  %v793_v13 = vld [vmem:[#allocation5 + $0x8] sm:$0xff]  }
  0x48   : > { %697 = vmatprep.subr.bf16.mxu0 %v894_v0  ;;  %s283_s29 = scalar_lea.vmem %s1052_s0, %s655_s23  ;;  %717 = vmatprep.subr.bf16.mxu1 %v894_v0  ;;  %v794_v14 = vld [vmem:[#allocation5 + $0x10] sm:$0xff]   ;;  %v795_v15 = vld [vmem:[#allocation5 + $0x18] sm:$0xff]   ;;  %v796_v16 = vld [vmem:[#allocation5 + $0x20] sm:$0xff]   ;;  %s291_s16 = scalar_lea.vmem %s1057_s5, %s655_s23 }
  0x49   : > { %v297_v4 = vld [vmem:[%s283_s29] sm:$0xff]  ;;  %v797_v17 = vld [vmem:[#allocation5 + $0x28] sm:$0xff]   ;;  %v798_v18 = vld [vmem:[#allocation5 + $0x30] sm:$0xff]  }
  0x4a   : > { %v298_v6 = vpack.c.bf16 %v297_v4, %v297_v4  ;;  %v799_v19 = vld [vmem:[#allocation5 + $0x38] sm:$0xff]  }
  0x4b   : > { %698 = vmatpush3.bf16.msra.mxu0 %v785_v2  ;;  %718 = vmatpush3.bf16.msra.mxu1 %v793_v13  ;;  %v657_v20 = vld [vmem:[%s1054_s2] ss:$0 sm:$0xff] }
  0x4c   : > { %699 = vmatprep.subr.bf16.mxu0 %v894_v0  ;;  %299 = vst [vmem:[#allocation2] sm:$0xf] %v298_v6  ;;  %719 = vmatprep.subr.bf16.mxu1 %v894_v0  ;;  %v674_v36 = vld [vmem:[%s1056_s4] ss:$0 sm:$0xff] }
  0x4f   : > { %700 = vmatpush3.bf16.msra.mxu0 %v786_v3  ;;  %720 = vmatpush3.bf16.msra.mxu1 %v794_v14 }
  0x50   : > { %701 = vmatprep.subr.bf16.mxu0 %v894_v0  ;;  %721 = vmatprep.subr.bf16.mxu1 %v894_v0 }
  0x53   : > { %702 = vmatpush3.bf16.msra.mxu0 %v787_v5  ;;  %v300_v12 = vld [vmem:[#allocation2] sm:$0xf]  ;;  %722 = vmatpush3.bf16.msra.mxu1 %v795_v15 }
  0x54   : > { %703 = vmatprep.subr.bf16.mxu0 %v894_v0  ;;  %723 = vmatprep.subr.bf16.mxu1 %v894_v0 }
  0x57   : > { %704 = vmatpush3.bf16.msra.mxu0 %v788_v8  ;;  %724 = vmatpush3.bf16.msra.mxu1 %v796_v16 }
  0x58   : > { %705 = vmatprep.subr.bf16.mxu0 %v894_v0  ;;  %725 = vmatprep.subr.bf16.mxu1 %v894_v0 }
  0x5b   : > { %706 = vmatpush3.bf16.msra.mxu0 %v789_v9  ;;  %726 = vmatpush3.bf16.msra.mxu1 %v797_v17 }
  0x5c   : > { %707 = vmatprep.subr.bf16.mxu0 %v894_v0  ;;  %727 = vmatprep.subr.bf16.mxu1 %v894_v0 }
  0x5f   : > { %708 = vmatpush3.bf16.msra.mxu0 %v790_v10  ;;  %728 = vmatpush3.bf16.msra.mxu1 %v798_v18 }
  0x60   : > { %709 = vmatprep.subr.bf16.mxu0 %v894_v0  ;;  %729 = vmatprep.subr.bf16.mxu1 %v894_v0 }
  0x63   : > { %710 = vmatpush3.bf16.msra.mxu0 %v791_v11  ;;  %730 = vmatpush3.bf16.msra.mxu1 %v799_v19 }
  0x66   : > { %712 = vmatmul.mubr.bf16.vlgmr.msra.gmra.mrb[0].mxu0 %v300_v12 }
 0x139   : > { %v406_v21 = vpop.f32.mrb[0].mxu0 }
 0x13a   : > { %v407_v22 = vadd.f32 %v657_v20, %v406_v21  ;;  %v713_v23 = vpop.f32.mrb[1].mxu0 }
 0x13b   : > { %v409_v24 = vpop.f32.mrb[2].mxu0 }
 0x13c   : > { %v412_v25 = vmul.f32 0.044715, %v407_v22  ;;  %v714_v26 = vpop.f32.mrb[3].mxu0  ;;  %v417_v32 = vmul.f32 0.5, %v407_v22 }
 0x13e   : > { %v413_v27 = vmul.f32 %v412_v25, %v407_v22 }
 0x140   : > { %v414_v28 = vmul.f32 %v413_v27, %v407_v22 }
 0x142   : > { %v415_v29 = vadd.f32 %v414_v28, %v407_v22 }
 0x144   : > { %v416_v30 = vmul.f32 0.7978846, %v415_v29 }
 0x146   : > { %800 = vtanh.f32 %v416_v30 }
 0x150   : > { %v801_v31 = vpop.eup %800 }
 0x151   : > { %v419_v33 = vadd.f32 1.0, %v801_v31 }
 0x153   : > { %v420_v34 = vmul.f32 %v419_v33, %v417_v32 }
 0x155   : > { %v421_v35 = vpack.c.bf16 %v420_v34, %v420_v34 }
 0x157   : > { %732 = vmatmul.mubr.bf16.vlgmr.msra.gmra.mrb[0].mxu1 %v421_v35 }
 0x22a   : > { %v520_v37 = vpop.f32.mrb[0].mxu1 }
 0x22b   : > { %v536_v38 = vadd.f32 %v674_v36, %v520_v37  ;;  %v733_v39 = vpop.f32.mrb[1].mxu1 }
 0x22c   : > { %v523_v40 = vpop.f32.mrb[2].mxu1 }
 0x22d   : > { %537 = vst [vmem:[%s291_s16] sm:$0xff] %v536_v38  ;;  %v734_v41 = vpop.f32.mrb[3].mxu1 }
 0x22e PF: > { %s17_s20 = sadd.s32 1, %s888_s20   ;;  %s1066_s18 = smov %s884_s19 }
 0x22f   : > { %p14_p8 = scmp.ge.s32.totalorder %s17_s20, 4   ;;  %s1067_s19 = smov %s1069_s22 }
 0x231   :  { %16 = sbr.rel (!%p14_p8) target bundleno = 3 (0x3), region = 96 }
 0x238   :  { %564 = vsyncpa [#allocation4], 1 }
 0x239   :  { %566 = vsyncpa [#allocation4 + $0x1], 1 }
 0x23a   :  { %567 = vsyncpa [#allocation6], 1 }

</bundles_post_ra>
